<compile_context>
chip_gen: v7x
topology: tpu7x:2x2x1
jax: 0.10.0
libtpu: 0.0.40
codegen_flags: <defaults>
</compile_context>

<pallas_src>
import functools

import jax
import jax.numpy as jnp
from jax.experimental import pallas as pl
from jax.experimental.pallas import tpu as pltpu

_LANES = 128
_SUBLANES = 8
_MIB = 1024 * 1024


def _round_up(x, m):
    return ((x + m - 1) // m) * m


def _cdiv(a, b):
    return (a + b - 1) // b


def _vmem_capacity_bytes():
    """Physical VMEM of the attached TPU; conservative fallback if unknown."""
    try:
        info = pltpu.get_tpu_info()
        cap = getattr(info, "vmem_capacity_bytes", None)
        if cap:
            return int(cap)
    except Exception:
        pass
    return 64 * _MIB  # v7x-sized: safe lower bound for every generation


def _regret_partial_kernel(w_ref, x_ref, out_ref, *, b, n, tb, tn,
                           eval_mode, mask_rows, mask_cols):
    """One (TB, TN) tile -> accumulate into a lane-dense (8, 128) f32 block.

    w_ref, x_ref : (TB, TN) VMEM tiles in their HBM dtype (upcast in-vreg).
    out_ref      : (1, 8, 128) f32, resident across the item (ni) axis.
    """
    bi = pl.program_id(0)
    ni = pl.program_id(1)

    @pl.when(ni == 0)
    def _init():
        out_ref[...] = jnp.zeros_like(out_ref)

    lane_groups = tn // _LANES
    sub_groups = tb // _SUBLANES

    row_ok = None
    if mask_rows:
        row_ids = jax.lax.broadcasted_iota(jnp.int32, (tb, _LANES), 0)
        row_ok = row_ids < (b - bi * tb)
    col_ids = None
    if mask_cols:
        col_ids = jax.lax.broadcasted_iota(jnp.int32, (tb, _LANES), 1)

    acc = jnp.zeros((_SUBLANES, _LANES), jnp.float32)
    for g in range(lane_groups):
        lo = g * _LANES
        hi = lo + _LANES
        wg = w_ref[:, lo:hi].astype(jnp.float32)
        xg = x_ref[:, lo:hi].astype(jnp.float32)
        if eval_mode:
            # torch.round == round-half-to-even == jnp.round
            xg = jnp.round(xg)
        pg = wg * xg  # (TB, 128) f32, pure VPU

        ok = None
        if mask_cols:
            ok = col_ids < (n - ni * tn - lo)
        if mask_rows:
            ok = row_ok if ok is None else (ok & row_ok)
        if ok is not None:
            pg = jnp.where(ok, pg, 0.0)

        # Sublane fold: (TB, 128) -> (8, 128) by summing the leading tile axis
        # (layout-preserving reshape, pure VPU adds, no XLU).
        acc = acc + jnp.sum(pg.reshape(sub_groups, _SUBLANES, _LANES), axis=0)

    out_ref[0] += acc


def _choose_tiles(b, n, w_item, x_item, tile_batch, tile_items):
    """Pick (tb, tn) and a vmem limit from per-step HBM-byte / VMEM targets."""
    n_pad = _round_up(n, _LANES)
    pair_bytes = w_item + x_item  # HBM bytes per (w, x) element pair

    vmem_cap = _vmem_capacity_bytes()
    if vmem_cap >= 100 * _MIB:                      # v5e / v6e class (128 MiB)
        step_input_target = 16 * _MIB               # amortize ~0.35us/step
        vmem_ceiling = min(96 * _MIB, int(0.75 * vmem_cap))
    else:                                           # v7x class (64 MiB)
        step_input_target = 12 * _MIB
        vmem_ceiling = min(52 * _MIB, int(0.8 * vmem_cap))
    vmem_ceiling = max(16 * _MIB, vmem_ceiling)

    # Item tile: multiple of 128, capped to bound per-step unroll (<=32 groups).
    if tile_items is not None:
        tn = _round_up(int(tile_items), _LANES)
    else:
        tn = min(n_pad, 32 * _LANES)
    tn = max(_LANES, min(tn, n_pad))

    # Batch tile from the per-step byte target (no fixed 512-row cap).
    if tile_batch is not None:
        tb = _round_up(int(tile_batch), _SUBLANES)
    else:
        tb = step_input_target // max(1, tn * pair_bytes)
        tb = max(_SUBLANES, (tb // _SUBLANES) * _SUBLANES)
    tb = min(tb, _round_up(b, _SUBLANES))

    # Keep >= 2 batch tiles when possible so the 'parallel' axis can still be
    # sharded across TensorCores (matters on dual-core parts).
    if tile_batch is None and b > _SUBLANES and _cdiv(b, tb) < 2:
        tb = max(_SUBLANES, _round_up(_cdiv(b, 2), _SUBLANES))

    # Live-VMEM estimate: input double-buffers + fused-fold f32 temporaries
    # ((TB,128)-sized, ~8 of them conservatively) + tiny output buffers.
    def live_bytes(tb_, tn_):
        inputs = 2 * tb_ * tn_ * pair_bytes          # 2 pipeline buffers each
        temps = 8 * tb_ * _LANES * 4
        out = 2 * _SUBLANES * _LANES * 4
        return inputs + temps + out

    while live_bytes(tb, tn) > int(0.9 * vmem_ceiling) and tb > _SUBLANES:
        tb = max(_SUBLANES, (tb // 2 // _SUBLANES) * _SUBLANES)
    while live_bytes(tb, tn) > int(0.9 * vmem_ceiling) and tn > _LANES:
        tn = max(_LANES, (tn // 2 // _LANES) * _LANES)

    vmem_limit = int(min(vmem_ceiling, max(8 * _MIB, 2 * live_bytes(tb, tn))))
    return tb, tn, vmem_limit


def regret_loss(w_true, x_pred, x_opt, opt_value, eval_mode=False,
                tile_batch=None, tile_items=None):
    """JAX/Pallas implementation of RegretLoss.forward."""
    del x_opt  # unused by the PyTorch forward as well
    b, n = w_true.shape
    assert x_pred.shape == (b, n)

    w_item = jnp.dtype(w_true.dtype).itemsize
    x_item = jnp.dtype(x_pred.dtype).itemsize
    tb, tn, vmem_limit = _choose_tiles(b, n, w_item, x_item,
                                       tile_batch, tile_items)

    num_btiles = _cdiv(b, tb)
    num_ntiles = _cdiv(n, tn)

    kernel = functools.partial(
        _regret_partial_kernel,
        b=b, n=n, tb=tb, tn=tn,
        eval_mode=bool(eval_mode),
        mask_rows=(b % tb != 0),
        mask_cols=(n % tn != 0),
    )

    partials = pl.pallas_call(
        kernel,
        out_shape=jax.ShapeDtypeStruct((num_btiles, _SUBLANES, _LANES),
                                       jnp.float32),
        grid_spec=pltpu.PrefetchScalarGridSpec(
            num_scalar_prefetch=0,
            grid=(num_btiles, num_ntiles),            # reduction axis last
            in_specs=[
                pl.BlockSpec((tb, tn), lambda i, j: (i, j)),   # w tile
                pl.BlockSpec((tb, tn), lambda i, j: (i, j)),   # x tile
            ],
            out_specs=pl.BlockSpec((1, _SUBLANES, _LANES),
                                   lambda i, j: (i, 0, 0)),
        ),
        compiler_params=pltpu.CompilerParams(
            dimension_semantics=("parallel", "arbitrary"),
            vmem_limit_bytes=vmem_limit,
        ),
        cost_estimate=pl.CostEstimate(
            flops=2 * b * n,
            transcendentals=0,
            bytes_accessed=(b * n * (w_item + x_item)
                            + num_btiles * _SUBLANES * _LANES * 4),
        ),
    )(w_true, x_pred)

    # Tiny epilogue in XLA: fold the partial blocks and do scalar arithmetic.
    sum_wx = jnp.sum(partials)
    sum_opt = jnp.sum(opt_value.astype(jnp.float32))
    sum_regret = sum_opt - sum_wx
    if eval_mode:
        # mean(regret) / mean(opt_value) == sum(regret) / sum(opt_value)
        return sum_regret / sum_opt
    return sum_regret / jnp.float32(b)


def _reference(w_true, x_pred, opt_value, eval_mode):
    """Plain-JAX reference matching the PyTorch semantics."""
    w = w_true.astype(jnp.float32)
    x = x_pred.astype(jnp.float32)
    ov = opt_value.astype(jnp.float32)
    if eval_mode:
        regret = ov - jnp.sum(w * jnp.round(x), axis=-1)
        return jnp.mean(regret) / jnp.mean(ov)
    regret = ov - jnp.sum(w * x, axis=-1)
    return jnp.mean(regret)


if __name__ == "__main__":
    key = jax.random.PRNGKey(0)

    def _make(key, batch, num_items, dtype=jnp.float32):
        k1, k2, k3, k4 = jax.random.split(key, 4)
        w_true = jax.random.uniform(k1, (batch, num_items), jnp.float32)
        x_pred = jax.random.uniform(k2, (batch, num_items), jnp.float32)
        x_opt = (jax.random.uniform(k3, (batch, num_items)) > 0.5
                 ).astype(jnp.float32)  # unused by forward, kept for API parity
        opt_value = (jnp.sum(w_true * x_opt, axis=-1)
                     + jax.random.uniform(k4, (batch,), jnp.float32))
        return (w_true.astype(dtype), x_pred.astype(dtype), x_opt,
                opt_value.astype(jnp.float32))

    keys = jax.random.split(key, 4)

    # Case 1: module-scale shapes (batch=2, num_items=16); single ragged tile.
    w1, x1, xo1, ov1 = _make(keys[0], batch=2, num_items=16)
    for eval_mode in (False, True):
        out = regret_loss(w1, x1, xo1, ov1, eval_mode=eval_mode)
        jax.block_until_ready(out)
        ref = _reference(w1, x1, ov1, eval_mode)
        assert jnp.allclose(out, ref, atol=1e-5, rtol=1e-5), (1, eval_mode, out, ref)

    # Case 2: multi batch-tile grid with a ragged last batch tile.
    w2, x2, xo2, ov2 = _make(keys[1], batch=40, num_items=256)
    for eval_mode in (False, True):
        out = regret_loss(w2, x2, xo2, ov2, eval_mode=eval_mode, tile_batch=16)
        jax.block_until_ready(out)
        ref = _reference(w2, x2, ov2, eval_mode)
        assert jnp.allclose(out, ref, atol=1e-5, rtol=1e-5), (2, eval_mode, out, ref)

    # Case 3: multi-tile on BOTH axes (item reduction axis + ragged rows/cols).
    w3, x3, xo3, ov3 = _make(keys[2], batch=40, num_items=300)
    for eval_mode in (False, True):
        out = regret_loss(w3, x3, xo3, ov3, eval_mode=eval_mode,
                          tile_batch=16, tile_items=128)
        jax.block_until_ready(out)
        ref = _reference(w3, x3, ov3, eval_mode)
        assert jnp.allclose(out, ref, atol=1e-5, rtol=1e-5), (3, eval_mode, out, ref)

    # Case 4: bf16 inputs stay bf16 in HBM, upcast in-vreg; default tiling.
    w4, x4, xo4, ov4 = _make(keys[3], batch=24, num_items=64, dtype=jnp.bfloat16)
    for eval_mode in (False, True):
        out = regret_loss(w4, x4, xo4, ov4, eval_mode=eval_mode)
        jax.block_until_ready(out)
        ref = _reference(w4, x4, ov4, eval_mode)
        assert jnp.allclose(out, ref, atol=1e-4, rtol=1e-4), (4, eval_mode, out, ref)

    print("KERNEL_OK")
</pallas_src>

<mosaic_0001>
module attributes {stable_mosaic.version = 11 : i64} {
  func.func @_regret_partial_kernel(%arg0: i32, %arg1: i32, %arg2: memref<8x128xf32, #tpu.memory_space<vmem>>, %arg3: memref<8x128xf32, #tpu.memory_space<vmem>>, %arg4: memref<1x8x128xf32, #tpu.memory_space<vmem>>) attributes {dimension_semantics = [#tpu.dimension_semantics<parallel>, #tpu.dimension_semantics<arbitrary>], iteration_bounds = array<i64: 1, 1>, scalar_prefetch = 0 : i64, scratch_operands = 0 : i64, tpu.core_type = #tpu.core_type<tc>, window_params = [{transform_indices = @transform_0, window_bounds = array<i64: 8, 128>}, {transform_indices = @transform_1, window_bounds = array<i64: 8, 128>}, {transform_indices = @transform_2, window_bounds = array<i64: 1, 8, 128>}]} {
    %c0_i32 = arith.constant 0 : i32
    %0 = arith.cmpi eq, %arg1, %c0_i32 : i32
    %1 = arith.extui %0 : i1 to i32
    %c0_i32_0 = arith.constant 0 : i32
    %2 = arith.cmpi ne, %1, %c0_i32_0 : i32
    scf.if %2 {
      %cst_13 = arith.constant 0.000000e+00 : f32
      %30 = vector.broadcast %cst_13 : f32 to vector<1x8x128xf32>
      %c0_14 = arith.constant 0 : index
      %c0_15 = arith.constant 0 : index
      %c0_16 = arith.constant 0 : index
      %31 = vector.load %arg4[%c0_14, %c0_15, %c0_16] : memref<1x8x128xf32, #tpu.memory_space<vmem>>, vector<1x8x128xf32>
      tpu.vector_store %arg4[%c0_14, %c0_15, %c0_16], %30 {strides = array<i32>} : memref<1x8x128xf32, #tpu.memory_space<vmem>>, vector<1x8x128xf32>,
    } else {
    }
    %3 = tpu.iota {dimensions = array<i32: 0>} : vector<8x128xi32>
    %c8_i32 = arith.constant 8 : i32
    %4 = arith.muli %arg0, %c8_i32 : i32
    %c2_i32 = arith.constant 2 : i32
    %5 = arith.subi %c2_i32, %4 : i32
    %6 = vector.broadcast %5 : i32 to vector<8x128xi32>
    %7 = arith.cmpi slt, %3, %6 : vector<8x128xi32>
    %8 = tpu.iota {dimensions = array<i32: 1>} : vector<8x128xi32>
    %cst = arith.constant 0.000000e+00 : f32
    %9 = vector.broadcast %cst : f32 to vector<8x128xf32>
    %c0 = arith.constant 0 : index
    %c0_1 = arith.constant 0 : index
    %10 = vector.load %arg2[%c0, %c0_1] : memref<8x128xf32, #tpu.memory_space<vmem>>, vector<8x128xf32>
    %c0_2 = arith.constant 0 : index
    %c0_3 = arith.constant 0 : index
    %11 = vector.load %arg3[%c0_2, %c0_3] : memref<8x128xf32, #tpu.memory_space<vmem>>, vector<8x128xf32>
    %12 = arith.mulf %10, %11 : vector<8x128xf32>
    %c128_i32 = arith.constant 128 : i32
    %13 = arith.muli %arg1, %c128_i32 : i32
    %c16_i32 = arith.constant 16 : i32
    %14 = arith.subi %c16_i32, %13 : i32
    %c0_i32_4 = arith.constant 0 : i32
    %15 = arith.subi %14, %c0_i32_4 : i32
    %16 = vector.broadcast %15 : i32 to vector<8x128xi32>
    %17 = arith.cmpi slt, %8, %16 : vector<8x128xi32>
    %18 = arith.andi %17, %7 : vector<8x128xi1>
    %cst_5 = arith.constant 0.000000e+00 : f32
    %19 = vector.broadcast %cst_5 : f32 to vector<8x128xf32>
    %20 = arith.select %18, %12, %19 : vector<8x128xi1>, vector<8x128xf32>
    %21 = vector.shape_cast %20 : vector<8x128xf32> to vector<1x8x128xf32>
    %cst_6 = arith.constant dense<0.000000e+00> : vector<8x128xf32>
    %22 = vector.multi_reduction <add>, %21, %cst_6 [0] : vector<1x8x128xf32> to vector<8x128xf32>
    %23 = arith.addf %9, %22 : vector<8x128xf32>
    %c0_7 = arith.constant 0 : index
    %c0_8 = arith.constant 0 : index
    %c0_9 = arith.constant 0 : index
    %24 = vector.load %arg4[%c0_7, %c0_8, %c0_9] : memref<1x8x128xf32, #tpu.memory_space<vmem>>, vector<1x8x128xf32>
    %25 = vector.shape_cast %24 : vector<1x8x128xf32> to vector<8x128xf32>
    %26 = arith.addf %25, %23 : vector<8x128xf32>
    %c0_10 = arith.constant 0 : index
    %c0_11 = arith.constant 0 : index
    %c0_12 = arith.constant 0 : index
    %27 = vector.load %arg4[%c0_10, %c0_11, %c0_12] : memref<1x8x128xf32, #tpu.memory_space<vmem>>, vector<1x8x128xf32>
    %28 = vector.shape_cast %27 : vector<1x8x128xf32> to vector<8x128xf32>
    %29 = vector.shape_cast %26 : vector<8x128xf32> to vector<1x8x128xf32>
    tpu.vector_store %arg4[%c0_10, %c0_11, %c0_12], %29 {strides = array<i32>} : memref<1x8x128xf32, #tpu.memory_space<vmem>>, vector<1x8x128xf32>,
    return
  }
  func.func @transform_0(%arg0: i32, %arg1: i32) -> (i32, i32) {
    %c0_i32 = arith.constant 0 : i32
    return %arg0, %arg1 : i32, i32
  }
  func.func @transform_1(%arg0: i32, %arg1: i32) -> (i32, i32) {
    %c0_i32 = arith.constant 0 : i32
    return %arg0, %arg1 : i32, i32
  }
  func.func @transform_2(%arg0: i32, %arg1: i32) -> (i32, i32, i32) {
    %c0_i32 = arith.constant 0 : i32
    %c0_i32_0 = arith.constant 0 : i32
    %c0_i32_1 = arith.constant 0 : i32
    return %arg0, %c0_i32, %c0_i32_0 : i32, i32, i32
  }
}

</mosaic_0001>

<bundles_post_ra>
// kernel: tpu_custom_call.1
= control target key start
LH: loop header
LB: loop body
LE: loop exit
PB: predicated region body
PF: predicated region fallthrough
CT: control target
= control target key end

     0   :  { %7 = vsyncpa [#allocation3], 0  ;;  %s167_s0 = inlined_call_operand.hbm [shape: f32[2,16], index: 0, kind: input, shape index: {}]   ;;  %s168_s1 = inlined_call_operand.vmem [shape: f32[2,16], index: 1, kind: input, shape index: {}]   ;;  %s169_s2 = inlined_call_operand.hbm [shape: f32[1,8,128], index: 2, kind: output, shape index: {}]  }
   0x1   :  { %8 = vsyncpa [#allocation4], 0 }
   0x2   :  { %13 = vsyncadd [#allocation3], 96  ;;  %s121_s9 = smov [#allocation2]   ;;  %s73_s13 = scalar_lea.hbm %s167_s0, 32 }
   0x3   :  { %s14_s10 = sshll.u32 %s121_s9, 4  ;;  %p74_p0 = scmp.ne.s32.totalorder %s167_s0, %s73_s13  ;;  %s15_s10 = int_to_ptr.vmem [resolvable:$true] %s14_s10 }
   0x4   :  { %p77_p1 = scmp.lt.u32.totalorder %s73_s13, %s167_s0 }
   0x6   :  { %p79_p2 = pnand %p77_p1, %p74_p0 }
   0x8   :  { %82 = shalt.err (!%p79_p2)
}
   0x9   :  { %s83_s18 = scalar_lea.vmem %s15_s10, 32  ;;  %s87_s19 = scalar_lea.vmem %s15_s10, 128 }
   0xa   :  { %p84_p3 = scmp.ne.s32.totalorder %s15_s10, %s83_s18  ;;  %p88_p4 = scmp.lt.s32.totalorder %s15_s10, %s15_s10 }
   0xb   :  { %p89_p5 = scmp.lt.s32.totalorder %s87_s19, %s83_s18 }
   0xd   :  { %p90_p6 = por %p89_p5, %p88_p4 }
   0xf   :  { %p91_p7 = pnand %p90_p6, %p84_p3 }
  0x11   :  { %94 = shalt.err (!%p91_p7)
}
  0x12   :  { %s122_s20 = smov 32   ;;  %s123_s21 = smov 2  }
  0x13   :  { %20 = dma.hbm_to_vmem [thread:$0]  %s167_s0, 32, %s15_s10, [#allocation3], %s122_s20, %s122_s20, %s123_s21  }
  0x14   :  { %117 = dma.done.wait [#allocation3], 128  }
  0x15   :  { %118 = vsyncadd [#allocation3], 4294967168  ;;  %v31_v0 = vlaneseq  ;;  %v39_v3 = vld [vmem:[#allocation2] sm:$0xff]  ;;  %s124_s26 = smov [#allocation5]  }
  0x16   :  { %v40_v4 = vld [vmem:[%s168_s1] sm:$0xff]  ;;  %s59_s27 = sshll.u32 %s124_s26, 4  ;;  %s60_s27 = int_to_ptr.vmem [resolvable:$true] %s59_s27 }
  0x17   :  { %v32_v1 = vshrl.u32 %v31_v0, 7  ;;  %v38_v2 = vand.u32 127, %v31_v0  ;;  %v41_v5 = vmul.f32 %v40_v4, %v39_v3  ;;  %s95_s0 = scalar_lea.vmem %s60_s27, 128  ;;  %p100_p9 = scmp.lt.s32.totalorder %s60_s27, %s60_s27 }
  0x18   :  { %p96_p8 = scmp.ne.s32.totalorder %s60_s27, %s95_s0  ;;  %p101_p10 = scmp.lt.s32.totalorder %s95_s0, %s95_s0 }
  0x19   :  { %vm36_vm0 = vcmp.lt.s32.totalorder %v32_v1, 2  ;;  %vm45_vm1 = vcmp.lt.s32.totalorder %v38_v2, 16 }
  0x1a   :  { %vm46_vm2 = vmand %vm45_vm1, %vm36_vm0  ;;  %p102_p11 = por %p101_p10, %p100_p9 }
  0x1b   :  { %v47_v6 = vsel %vm46_vm2, %v41_v5, 0.0 }
  0x1c   :  { %52 = vst [vmem:[#allocation5] sm:$0xff] %v47_v6  ;;  %p103_p12 = pnand %p102_p11, %p96_p8 }
  0x1e   :  { %106 = shalt.err (!%p103_p12)
}
  0x1f   :  { %s107_s30 = scalar_lea.hbm %s169_s2, 128 }
  0x20   :  { %p108_p13 = scmp.ne.s32.totalorder %s169_s2, %s107_s30  ;;  %p111_p0 = scmp.lt.u32.totalorder %s107_s30, %s169_s2 }
  0x22   :  { %p113_p1 = pnand %p111_p0, %p108_p13 }
  0x24   :  { %116 = shalt.err (!%p113_p1)
}
  0x25   :  { %62 = dma.vmem_to_hbm [thread:$0]  %s60_s27, 128, %s169_s2, [#allocation4]  }
  0x26   :  { %119 = dma.done.wait [#allocation4], 128  }
  0x27   :  { %120 = vsyncadd [#allocation4], 4294967168 }
  0x28   :  { %66 = vsyncpa [#allocation3], 1 }
  0x29   :  { %67 = vsyncpa [#allocation4], 1 }

</bundles_post_ra>
